<compile_context>
chip_gen: v5e
topology: v5e:2x2
jax: 0.10.0
libtpu: 0.0.40
codegen_flags: <defaults>
</compile_context>

<pallas_src>
import jax
import jax.numpy as jnp
from jax.experimental import pallas as pl
from jax.experimental.pallas import tpu as pltpu


def _sigmoid_eup(h):
    # sigmoid(h) = 0.5 * tanh(0.5 * h) + 0.5  -> single EUP transcendental.
    return 0.5 * jnp.tanh(0.5 * h) + 0.5


def _mlp_packed_kernel(x_ref, params_ref, o_ref):
    # x_ref:      (1, B)   batch along lanes (Ni == 1)
    # params_ref: (Nh, 4)  col0 = w1[:,0], col1 = b1, col2 = w2^T, col3 = b2
    # o_ref:      (1, B)   (No == 1)
    x = x_ref[...]                            # (1, B)
    w1 = params_ref[:, 0:1]                   # (Nh, 1)
    b1 = params_ref[:, 1:2]                   # (Nh, 1)
    w2c = params_ref[:, 2:3]                  # (Nh, 1)
    b2 = params_ref[0:1, 3:4]                 # (1, 1)

    # Layer 1: degenerate K=1 contraction as a VPU broadcast FMA.
    h = w1 * x + b1                           # (Nh, B)

    # Sigmoid on the EUP.
    h = _sigmoid_eup(h)                       # (Nh, B)

    # Layer 2 (No = 1): VPU multiply + XLU sublane reduce, no MXU latency.
    y = jnp.sum(w2c * h, axis=0, keepdims=True) + b2   # (1, B)
    o_ref[...] = y.astype(o_ref.dtype)


def _mlp_general_kernel(x_ref, w1_ref, b1_ref, w2_ref, b2_ref, o_ref):
    # Fallback for Ni > 1 or No > 1 (still feature-major / lane-dense over B).
    x = x_ref[...]                                        # (Ni, B)
    h = jnp.dot(w1_ref[...], x,
                preferred_element_type=jnp.float32) + b1_ref[...]
    h = _sigmoid_eup(h)
    y = jnp.dot(w2_ref[...], h,
                preferred_element_type=jnp.float32) + b2_ref[...]
    o_ref[...] = y.astype(o_ref.dtype)


def pack_params(w1, b1, w2, b2):
    """Pack (Nh,1) w1, (Nh,) b1, (1,Nh) w2, (1,) b2 into one (Nh, 4) slab.

    Built once outside the per-call path since the weights are static.
    """
    Nh = w1.shape[0]
    col_w1 = w1.reshape(Nh, 1).astype(jnp.float32)
    col_b1 = b1.reshape(Nh, 1).astype(jnp.float32)
    col_w2 = w2.reshape(1, Nh).T.astype(jnp.float32)
    col_b2 = jnp.full((Nh, 1), b2.reshape(-1)[0], dtype=jnp.float32)
    return jnp.concatenate([col_w1, col_b1, col_w2, col_b2], axis=1)


def net_forward_packed(x, params):
    """Forward pass with pre-packed parameters (Ni == 1, No == 1 path).

    x:      (B, 1) float32
    params: (Nh, 4) float32 from pack_params
    Returns (B, 1) float32.
    """
    B = x.shape[0]
    Nh = params.shape[0]
    vmem = pl.BlockSpec(memory_space=pltpu.MemorySpace.VMEM)

    cost = pl.CostEstimate(
        flops=4 * Nh * B,            # layer-1 FMA + layer-2 mul/reduce
        transcendentals=Nh * B,      # one tanh per hidden activation
        bytes_accessed=(x.size + params.size + B) * 4,
    )

    x_t = x.reshape(1, B)            # size-1-dim transpose: pure reshape
    y_t = pl.pallas_call(
        _mlp_packed_kernel,
        out_shape=jax.ShapeDtypeStruct((1, B), jnp.float32),
        in_specs=[vmem, vmem],
        out_specs=vmem,
        cost_estimate=cost,
    )(x_t, params)
    return y_t.reshape(B, 1)


def net_forward(x, w1, b1, w2, b2):
    """Forward pass of Net (PyTorch layouts).

    x:  (B, Ni) float32
    w1: (Nh, Ni) float32 (torch fc1.weight)
    b1: (Nh,)   float32
    w2: (No, Nh) float32 (torch out.weight)
    b2: (No,)   float32
    Returns (B, No) float32.
    """
    B, Ni = x.shape
    Nh = w1.shape[0]
    No = w2.shape[0]

    if Ni == 1 and No == 1:
        return net_forward_packed(x, pack_params(w1, b1, w2, b2))

    # General (unpacked) path — same feature-major layout, MXU dots.
    vmem = pl.BlockSpec(memory_space=pltpu.MemorySpace.VMEM)
    cost = pl.CostEstimate(
        flops=2 * Ni * Nh * B + 2 * Nh * No * B,
        transcendentals=Nh * B,
        bytes_accessed=(x.size + w1.size + b1.size + w2.size + b2.size
                        + No * B) * 4,
    )
    y_t = pl.pallas_call(
        _mlp_general_kernel,
        out_shape=jax.ShapeDtypeStruct((No, B), jnp.float32),
        in_specs=[vmem] * 5,
        out_specs=vmem,
        cost_estimate=cost,
    )(x.T, w1, b1.reshape(Nh, 1), w2, b2.reshape(No, 1))
    return y_t.T


if __name__ == "__main__":
    Ni, Nh, No = 1, 32, 1
    B = 128  # matches `x = torch.rand(128, 1)` in the reference script

    key = jax.random.PRNGKey(0)
    kx, kw1, kb1, kw2, kb2 = jax.random.split(key, 5)

    # Deterministic parameter init (PyTorch Linear-style uniform bounds),
    # torch-native layouts: weight is (out_features, in_features).
    bound1 = 1.0 / (Ni ** 0.5)
    bound2 = 1.0 / (Nh ** 0.5)
    x = jax.random.uniform(kx, (B, Ni), dtype=jnp.float32)
    w1 = jax.random.uniform(kw1, (Nh, Ni), minval=-bound1, maxval=bound1,
                            dtype=jnp.float32)
    b1 = jax.random.uniform(kb1, (Nh,), minval=-bound1, maxval=bound1,
                            dtype=jnp.float32)
    w2 = jax.random.uniform(kw2, (No, Nh), minval=-bound2, maxval=bound2,
                            dtype=jnp.float32)
    b2 = jax.random.uniform(kb2, (No,), minval=-bound2, maxval=bound2,
                            dtype=jnp.float32)

    # Pack the static parameters once (outside the per-call path).
    params = pack_params(w1, b1, w2, b2)

    out = net_forward_packed(x, params)
    jax.block_until_ready(out)

    # Reference check in plain JAX (same math as the PyTorch module).
    ref = jax.nn.sigmoid(x @ w1.T + b1) @ w2.T + b2
    assert out.shape == (B, No)
    assert jnp.allclose(out, ref, atol=1e-5, rtol=1e-5)

    print("KERNEL_OK")
</pallas_src>

<mosaic_0001>
module attributes {stable_mosaic.version = 11 : i64} {
  func.func @_mlp_packed_kernel(%arg0: memref<1x128xf32, #tpu.memory_space<vmem>>, %arg1: memref<32x4xf32, #tpu.memory_space<vmem>>, %arg2: memref<1x128xf32, #tpu.memory_space<vmem>>) attributes {dimension_semantics = [], scalar_prefetch = 0 : i64, scratch_operands = 0 : i64, tpu.core_type = #tpu.core_type<tc>} {
    %c0 = arith.constant 0 : index
    %c0_0 = arith.constant 0 : index
    %0 = vector.load %arg0[%c0, %c0_0] : memref<1x128xf32, #tpu.memory_space<vmem>>, vector<1x128xf32>
    %c0_1 = arith.constant 0 : index
    %c0_2 = arith.constant 0 : index
    %1 = vector.load %arg1[%c0_1, %c0_2] : memref<32x4xf32, #tpu.memory_space<vmem>>, vector<32x1xf32>
    %c0_3 = arith.constant 0 : index
    %c1 = arith.constant 1 : index
    %2 = vector.load %arg1[%c0_3, %c1] : memref<32x4xf32, #tpu.memory_space<vmem>>, vector<32x1xf32>
    %c0_4 = arith.constant 0 : index
    %c2 = arith.constant 2 : index
    %3 = vector.load %arg1[%c0_4, %c2] : memref<32x4xf32, #tpu.memory_space<vmem>>, vector<32x1xf32>
    %c0_5 = arith.constant 0 : index
    %c3 = arith.constant 3 : index
    %4 = vector.load %arg1[%c0_5, %c3] : memref<32x4xf32, #tpu.memory_space<vmem>>, vector<1x1xf32>
    %5 = vector.broadcast %1 : vector<32x1xf32> to vector<32x128xf32>
    %6 = vector.broadcast %0 : vector<1x128xf32> to vector<32x128xf32>
    %7 = arith.mulf %5, %6 : vector<32x128xf32>
    %8 = vector.broadcast %2 : vector<32x1xf32> to vector<32x128xf32>
    %9 = arith.addf %7, %8 : vector<32x128xf32>
    %cst = arith.constant 5.000000e-01 : f32
    %10 = vector.broadcast %cst : f32 to vector<32x128xf32>
    %11 = arith.mulf %10, %9 : vector<32x128xf32>
    %12 = math.tanh %11 : vector<32x128xf32>
    %cst_6 = arith.constant 5.000000e-01 : f32
    %13 = vector.broadcast %cst_6 : f32 to vector<32x128xf32>
    %14 = arith.mulf %13, %12 : vector<32x128xf32>
    %cst_7 = arith.constant 5.000000e-01 : f32
    %15 = vector.broadcast %cst_7 : f32 to vector<32x128xf32>
    %16 = arith.addf %14, %15 : vector<32x128xf32>
    %17 = vector.broadcast %3 : vector<32x1xf32> to vector<32x128xf32>
    %18 = arith.mulf %17, %16 : vector<32x128xf32>
    %cst_8 = arith.constant dense<0.000000e+00> : vector<128xf32>
    %19 = vector.multi_reduction <add>, %18, %cst_8 [0] : vector<32x128xf32> to vector<128xf32>
    %20 = vector.shape_cast %19 : vector<128xf32> to vector<1x128xf32>
    %21 = vector.broadcast %4 : vector<1x1xf32> to vector<1x128xf32>
    %22 = arith.addf %20, %21 : vector<1x128xf32>
    %c0_9 = arith.constant 0 : index
    %c0_10 = arith.constant 0 : index
    %23 = vector.load %arg2[%c0_9, %c0_10] : memref<1x128xf32, #tpu.memory_space<vmem>>, vector<1x128xf32>
    tpu.vector_store %arg2[%c0_9, %c0_10], %22 {strides = array<i32>} : memref<1x128xf32, #tpu.memory_space<vmem>>, vector<1x128xf32>,
    return
  }
}

</mosaic_0001>

<bundles_post_ra>
// kernel: tpu_custom_call.1
= control target key start
LH: loop header
LB: loop body
LE: loop exit
PB: predicated region body
PF: predicated region fallthrough
CT: control target
= control target key end

     0   :  { %v184_v2 = vmov 0   ;;  %s225_s0 = inlined_call_operand.vmem [shape: f32[1,128], index: 0, kind: input, shape index: {}]   ;;  %s226_s1 = inlined_call_operand.vmem [shape: f32[32,4], index: 1, kind: input, shape index: {}]   ;;  %s227_s2 = inlined_call_operand.hbm [shape: f32[1,128], index: 2, kind: output, shape index: {}]  }
   0x1   :  { %v15_v0 = vld [vmem:[%s226_s1 + $0x10] sm:$0xff]  ;;  %v13_v1 = vld [vmem:[%s226_s1] sm:$0xff]  ;;  %139 = vset.pattern.permute.xlu1 %v184_v2  ;;  %138 = vset.pattern.permute.xlu0 %v184_v2 }
   0x2   :  { %7 = vsyncpa [#allocation3], 0  ;;  %30 = vperm.xlu1 %139, %v15_v0   ;;  %20 = vperm.xlu0 %138, %v13_v1   ;;  %v14_v3 = vld [vmem:[%s226_s1 + $0x8] sm:$0xff]  ;;  %v185_v4 = vmov 1   ;;  %v16_v5 = vld [vmem:[%s226_s1 + $0x18] sm:$0xff]  ;;  %v186_v6 = vmov 2  }
   0x3   :  { %141 = vset.pattern.permute.xlu2 %v185_v4  ;;  %v17_v7 = vld [vmem:[%s226_s1] sm:$0x1]  ;;  %v187_v8 = vmov 3   ;;  %s124_s23 = sshll.u32 %s227_s2, 4  ;;  %s125_s23 = int_to_ptr.hbm [resolvable:$true] %s124_s23 }
   0x4   :  { %50 = vperm.xlu2 %141, %v14_v3   ;;  %v149_v12 = vld [vmem:[%s225_s0] ss:$0 sm:$0xff]  ;;  %s188_s0 = smov [#allocation2]  }
   0x5   :  { %s122_s1 = sshll.u32 %s188_s0, 4  ;;  %s123_s1 = int_to_ptr.vmem [resolvable:$true] %s122_s1 }
   0xa   :  { %140 = vset.pattern.permute.xlu1 %v185_v4  ;;  %25 = vperm.xlu0 %138, %v14_v3  }
   0xb   :  { %46 = vperm.xlu1 %140, %v13_v1  }
   0xc   :  { %142 = vset.pattern.permute.xlu2 %v184_v2 }
   0xd   :  { %35 = vperm.xlu2 %142, %v16_v5  }
  0x12   :  { %143 = vset.pattern.permute.xlu0 %v185_v4 }
  0x13   :  { %58 = vperm.xlu1 %140, %v16_v5   ;;  %54 = vperm.xlu0 %143, %v15_v0  }
  0x15   :  { %144 = vset.pattern.permute.xlu2 %v186_v6 }
  0x16   :  { %82 = vperm.xlu2 %144, %v13_v1  }
  0x1b   :  { %145 = vset.pattern.permute.xlu1 %v186_v6  ;;  %146 = vset.pattern.permute.xlu0 %v186_v6 }
  0x1c   :  { %86 = vperm.xlu1 %145, %v14_v3   ;;  %94 = vperm.xlu0 %146, %v16_v5  }
  0x1e   :  { %90 = vperm.xlu2 %144, %v15_v0  }
  0x24   :  { %147 = vset.pattern.permute.xlu1 %v187_v8  ;;  %148 = vset.pattern.permute.xlu0 %v187_v8 }
  0x25   :  { %112 = vperm.xlu1 %147, %v17_v7  }
  0x5e   :  { %v51_v11 = vpop.permute.xlu2 %50 }
  0x67   :  { %v36_v20 = vpop.permute.xlu2 %35 }
  0x68   :  { %v44_v22 = vmul.f32 %v149_v12, %v36_v20 }
  0x70   :  { %v83_v33 = vpop.permute.xlu2 %82 }
  0x74   :  { %v21_v9 = vpop.permute.xlu0 %20  ;;  %v31_v10 = vpop.permute.xlu1 %30 }
  0x75   :  { %v41_v13 = vmul.f32 %v149_v12, %v21_v9  ;;  %v43_v23 = vmul.f32 %v149_v12, %v31_v10 }
  0x78   :  { %v91_v46 = vpop.permute.xlu2 %90 }
  0x7c   :  { %v26_v14 = vpop.permute.xlu0 %25 }
  0x7d   :  { %v42_v15 = vmul.f32 %v149_v12, %v26_v14  ;;  %v47_v16 = vpop.permute.xlu1 %46 }
  0x7e   :  { %v61_v17 = vadd.f32 %v47_v16, %v41_v13 }
  0x7f   :  { %v62_v18 = vadd.f32 %v51_v11, %v42_v15 }
  0x80   :  { %v65_v19 = vmul.f32 0.5, %v61_v17 }
  0x81   :  { %v66_v21 = vmul.f32 0.5, %v62_v18 }
  0x82   :  { %150 = vtanh.f32 %v65_v19 }
  0x83   :  { %152 = vtanh.f32 %v66_v21 }
  0x85   :  { %v59_v24 = vpop.permute.xlu1 %58  ;;  %v55_v25 = vpop.permute.xlu0 %54 }
  0x86   :  { %v64_v26 = vadd.f32 %v59_v24, %v44_v22  ;;  %v63_v27 = vadd.f32 %v55_v25, %v43_v23 }
  0x88   :  { %v151_v28 = vpop.eup %150  ;;  %v68_v29 = vmul.f32 0.5, %v64_v26  ;;  %v67_v30 = vmul.f32 0.5, %v63_v27 }
  0x89   :  { %v153_v31 = vpop.eup %152  ;;  %v73_v34 = vmul.f32 0.5, %v151_v28 }
  0x8a   :  { %154 = vtanh.f32 %v68_v29  ;;  %v74_v32 = vmul.f32 0.5, %v153_v31 }
  0x8b   :  { %156 = vtanh.f32 %v67_v30  ;;  %v77_v38 = vadd.f32 0.5, %v73_v34 }
  0x8c   :  { %v78_v35 = vadd.f32 0.5, %v74_v32 }
  0x8d   :  { %v97_v43 = vmul.f32 %v83_v33, %v77_v38 }
  0x8e   :  { %v87_v36 = vpop.permute.xlu1 %86  ;;  %v95_v47 = vpop.permute.xlu0 %94 }
  0x8f   :  { %v98_v42 = vmul.f32 %v87_v36, %v78_v35 }
  0x90   :  { %v155_v37 = vpop.eup %154 }
  0x91   :  { %v157_v39 = vpop.eup %156  ;;  %v76_v40 = vmul.f32 0.5, %v155_v37  ;;  %v101_v49 = vadd.f32 %v98_v42, %v97_v43 }
  0x92   :  { %v75_v41 = vmul.f32 0.5, %v157_v39 }
  0x93   :  { %v80_v45 = vadd.f32 0.5, %v76_v40 }
  0x94   :  { %v79_v44 = vadd.f32 0.5, %v75_v41 }
  0x95   :  { %v100_v50 = vmul.f32 %v95_v47, %v80_v45 }
  0x96   :  { %v99_v48 = vmul.f32 %v91_v46, %v79_v44 }
  0x97   :  { %v113_v58 = vpop.permute.xlu1 %112 }
  0x98   :  { %v102_v51 = vadd.f32 %v101_v49, %v99_v48 }
  0x9a   :  { %v103_v52 = vadd.f32 %v102_v51, %v100_v50 }
  0x9c   :  { %v104_v53 = vrot.slane %v103_v52, 4 }
  0x9e   :  { %v105_v54 = vadd.f32 %v104_v53, %v103_v52 }
  0xa0   :  { %v106_v55 = vrot.slane %v105_v54, 2 }
  0xa2   :  { %v107_v56 = vadd.f32 %v106_v55, %v105_v54 }
  0xa4   :  { %v108_v57 = vrot.slane %v107_v56, 1 }
  0xa6   :  { %v109_v59 = vadd.f32 %v108_v57, %v107_v56 }
  0xa8   :  { %v115_v60 = vadd.f32 %v113_v58, %v109_v59 }
  0xaa   :  { %116 = vst [vmem:[#allocation2] sm:$0x1] %v115_v60 }
  0xab   :  { %127 = dma.vmem_to_hbm [thread:$0]  %s123_s1, 16, %s125_s23, [#allocation3]  }
  0xac   :  { %182 = dma.done.wait [#allocation3], 16  }
  0xad   :  { %183 = vsyncadd [#allocation3], 4294967280 }
  0xae   :  { %132 = vsyncpa [#allocation3], 1 }

</bundles_post_ra>
